<compile_context>
chip_gen: v7x
topology: tpu7x:2x2x1
jax: 0.10.0
libtpu: 0.0.40
codegen_flags: <defaults>
</compile_context>

<pallas_src>
import jax
import jax.numpy as jnp
from jax.experimental import pallas as pl
from jax.experimental.pallas import tpu as pltpu

# ---------------- problem sizes (small, consistent with the forward) ---------
B = 2      # batch
S = 8      # sequence length
H = 32     # hidden size
V = 64     # vocab size (embedding rows)


def last_token_logit_kernel(idx_ref, table_ref, w_enc_ref, b_enc_ref,
                            w_log_ref, b_log_ref, out_ref):
    """Fused gather + encoder projection + tanh + logit head for the last tokens.

    idx_ref   : (B, 1)  int32, last-token id per sequence           (VMEM)
    table_ref : (V, H)  embedding table                             (VMEM)
    w_enc_ref : (H, H)  encoder projection weight                   (VMEM)
    b_enc_ref : (1, H)  encoder bias                                (VMEM)
    w_log_ref : (1, H)  logit weight (PyTorch Linear (out,in) row)  (VMEM)
    b_log_ref : (1, 1)  logit bias scalar                           (SMEM)
    out_ref   : (B, 1)  per-sequence logit                          (VMEM)
    """
    bsz = out_ref.shape[0]
    vocab = table_ref.shape[0]

    # Fused embedding gather: one-hot selector (VPU) + single bf16 MXU matmul.
    ids = idx_ref[...]                                              # (B, 1) int32
    lane = jax.lax.broadcasted_iota(jnp.int32, (bsz, vocab), 1)     # (B, V)
    onehot = (lane == ids).astype(jnp.float32).astype(jnp.bfloat16)  # (B, V) exact 0/1
    emb = jnp.dot(onehot, table_ref[...].astype(jnp.bfloat16),
                  preferred_element_type=jnp.float32)               # (B, H) fp32

    # Encoder projection: bf16 MXU operands, fp32 accumulation; bias + tanh in fp32.
    h = jnp.tanh(
        jnp.dot(emb.astype(jnp.bfloat16), w_enc_ref[...].astype(jnp.bfloat16),
                preferred_element_type=jnp.float32)
        + b_enc_ref[...])                                           # (B, H) fp32

    # Logit head (output width 1): VPU multiply + lane reduce instead of a
    # 1-column MXU matmul; bias added as an SMEM scalar.
    logits = jnp.sum(h * w_log_ref[...], axis=-1, keepdims=True)    # (B, 1) fp32
    out_ref[...] = logits + b_log_ref[0, 0]


def model_wrapper_forward(dynamic_indices, params):
    """Equivalent of ModelWrapper.forward(dynamic_indices) -> (B,) float32."""
    emb_table, w_enc, b_enc, w_log, b_log = params
    bsz, _seq = dynamic_indices.shape

    # `.long()` modeled as int32 (tiny vocab). Only indices[:, -1] is needed:
    # the encoder is per-token and only the last hidden state feeds the logit head.
    idx_last = dynamic_indices.astype(jnp.int32)[:, -1:]            # (B, 1)

    logits = pl.pallas_call(
        last_token_logit_kernel,
        out_shape=jax.ShapeDtypeStruct((bsz, 1), jnp.float32),
        in_specs=[
            pl.BlockSpec(memory_space=pltpu.MemorySpace.VMEM),      # idx_last
            pl.BlockSpec(memory_space=pltpu.MemorySpace.VMEM),      # emb_table
            pl.BlockSpec(memory_space=pltpu.MemorySpace.VMEM),      # w_enc
            pl.BlockSpec(memory_space=pltpu.MemorySpace.VMEM),      # b_enc
            pl.BlockSpec(memory_space=pltpu.MemorySpace.VMEM),      # w_log
            pl.BlockSpec(memory_space=pltpu.MemorySpace.SMEM),      # b_log scalar
        ],
        out_specs=pl.BlockSpec(memory_space=pltpu.MemorySpace.VMEM),
    )(idx_last, emb_table, w_enc, b_enc, w_log, b_log)

    # squeeze(-1) -> (B,)
    return logits.reshape(bsz)


def reference_forward(dynamic_indices, params):
    """Literal (all-token) reference mirroring the module + autocast modeling."""
    emb_table, w_enc, b_enc, w_log, b_log = params
    idx = dynamic_indices.astype(jnp.int32)
    emb = emb_table[idx]                                            # (B, S, H)
    h = jnp.tanh(
        jnp.dot(emb.astype(jnp.bfloat16), w_enc.astype(jnp.bfloat16),
                preferred_element_type=jnp.float32) + b_enc)        # (B, S, H)
    h_last = h[:, -1, :]                                            # (B, H)
    out = h_last @ w_log.T + b_log                                  # (B, 1)
    return out[:, 0]                                                # (B,)


def init_params(key):
    k1, k2, k3, k4, k5 = jax.random.split(key, 5)
    emb_table = jax.random.normal(k1, (V, H), jnp.float32) * 0.02
    w_enc = jax.random.normal(k2, (H, H), jnp.float32) * (1.0 / jnp.sqrt(H))
    b_enc = jax.random.normal(k3, (1, H), jnp.float32) * 0.01
    w_log = jax.random.normal(k4, (1, H), jnp.float32) * (1.0 / jnp.sqrt(H))  # (out,in)
    b_log = jax.random.normal(k5, (1, 1), jnp.float32) * 0.01
    return emb_table, w_enc, b_enc, w_log, b_log


if __name__ == "__main__":
    # Deterministic synthetic parameters (no checkpoint load).
    params = init_params(jax.random.PRNGKey(42))

    # Deterministic example input: integer token indices, shape (B, S).
    key = jax.random.PRNGKey(0)
    dynamic_indices = jax.random.randint(key, (B, S), 0, V, dtype=jnp.int32)

    forward = jax.jit(model_wrapper_forward)
    out = forward(dynamic_indices, params)
    out = jax.block_until_ready(out)

    ref = reference_forward(dynamic_indices, params)
    assert out.shape == (B,), out.shape
    assert jnp.allclose(out, ref, atol=1e-4, rtol=1e-4), (out, ref)

    print("KERNEL_OK")
</pallas_src>

<mosaic_0001>
module attributes {stable_mosaic.version = 11 : i64} {
  func.func @last_token_logit_kernel(%arg0: memref<2x1xi32, #tpu.memory_space<vmem>>, %arg1: memref<64x32xf32, #tpu.memory_space<vmem>>, %arg2: memref<32x32xf32, #tpu.memory_space<vmem>>, %arg3: memref<1x32xf32, #tpu.memory_space<vmem>>, %arg4: memref<1x32xf32, #tpu.memory_space<vmem>>, %arg5: memref<1x1xf32, #tpu.memory_space<smem>>, %arg6: memref<2x1xf32, #tpu.memory_space<vmem>>) attributes {dimension_semantics = [], scalar_prefetch = 0 : i64, scratch_operands = 0 : i64, tpu.core_type = #tpu.core_type<tc>} {
    %c0 = arith.constant 0 : index
    %c0_0 = arith.constant 0 : index
    %0 = vector.load %arg0[%c0, %c0_0] : memref<2x1xi32, #tpu.memory_space<vmem>>, vector<2x1xi32>
    %1 = tpu.iota {dimensions = array<i32: 1>} : vector<2x64xi32>
    %2 = vector.broadcast %0 : vector<2x1xi32> to vector<2x64xi32>
    %3 = arith.cmpi eq, %1, %2 : vector<2x64xi32>
    %4 = arith.extui %3 : vector<2x64xi1> to vector<2x64xi32>
    %5 = arith.sitofp %4 : vector<2x64xi32> to vector<2x64xf32>
    %6 = arith.truncf %5 : vector<2x64xf32> to vector<2x64xbf16>
    %c0_1 = arith.constant 0 : index
    %c0_2 = arith.constant 0 : index
    %7 = vector.load %arg1[%c0_1, %c0_2] : memref<64x32xf32, #tpu.memory_space<vmem>>, vector<64x32xf32>
    %8 = arith.truncf %7 : vector<64x32xf32> to vector<64x32xbf16>
    %cst = arith.constant dense<0.000000e+00> : vector<2x32xf32>
    %9 = tpu.matmul %6, %8, %cst {dimension_numbers = #tpu.dot_dimension_numbers<[1], [0], [0], [1], [0, 0, 1, 1], [], []>} : vector<2x64xbf16>, vector<64x32xbf16>, vector<2x32xf32> -> vector<2x32xf32>
    %10 = arith.truncf %9 : vector<2x32xf32> to vector<2x32xbf16>
    %c0_3 = arith.constant 0 : index
    %c0_4 = arith.constant 0 : index
    %11 = vector.load %arg2[%c0_3, %c0_4] : memref<32x32xf32, #tpu.memory_space<vmem>>, vector<32x32xf32>
    %12 = arith.truncf %11 : vector<32x32xf32> to vector<32x32xbf16>
    %cst_5 = arith.constant dense<0.000000e+00> : vector<2x32xf32>
    %13 = tpu.matmul %10, %12, %cst_5 {dimension_numbers = #tpu.dot_dimension_numbers<[1], [0], [0], [1], [0, 0, 1, 1], [], []>} : vector<2x32xbf16>, vector<32x32xbf16>, vector<2x32xf32> -> vector<2x32xf32>
    %c0_6 = arith.constant 0 : index
    %c0_7 = arith.constant 0 : index
    %14 = vector.load %arg3[%c0_6, %c0_7] : memref<1x32xf32, #tpu.memory_space<vmem>>, vector<1x32xf32>
    %15 = vector.broadcast %14 : vector<1x32xf32> to vector<2x32xf32>
    %16 = arith.addf %13, %15 : vector<2x32xf32>
    %17 = math.tanh %16 : vector<2x32xf32>
    %c0_8 = arith.constant 0 : index
    %c0_9 = arith.constant 0 : index
    %18 = vector.load %arg4[%c0_8, %c0_9] : memref<1x32xf32, #tpu.memory_space<vmem>>, vector<1x32xf32>
    %19 = vector.broadcast %18 : vector<1x32xf32> to vector<2x32xf32>
    %20 = arith.mulf %17, %19 : vector<2x32xf32>
    %cst_10 = arith.constant dense<0.000000e+00> : vector<2xf32>
    %21 = vector.multi_reduction <add>, %20, %cst_10 [1] : vector<2x32xf32> to vector<2xf32>
    %22 = vector.shape_cast %21 : vector<2xf32> to vector<2x1xf32>
    %c0_11 = arith.constant 0 : index
    %c0_12 = arith.constant 0 : index
    %23 = memref.load %arg5[%c0_11, %c0_12] : memref<1x1xf32, #tpu.memory_space<smem>>
    %24 = vector.broadcast %23 : f32 to vector<2x1xf32>
    %25 = arith.addf %22, %24 : vector<2x1xf32>
    %c0_13 = arith.constant 0 : index
    %c0_14 = arith.constant 0 : index
    %26 = vector.load %arg6[%c0_13, %c0_14] : memref<2x1xf32, #tpu.memory_space<vmem>>, vector<2x1xf32>
    tpu.vector_store %arg6[%c0_13, %c0_14], %25 {strides = array<i32>} : memref<2x1xf32, #tpu.memory_space<vmem>>, vector<2x1xf32>,
    return
  }
}

</mosaic_0001>

<bundles_post_ra>
// kernel: model_wrapper_forward.1
= control target key start
LH: loop header
LB: loop body
LE: loop exit
PB: predicated region body
PF: predicated region fallthrough
CT: control target
= control target key end

     0   :  { %v210_v0 = vmov 0   ;;  %v211_v2 = vmov 0.0   ;;  %vm212_vm0 = vmmov 0   ;;  %v26_v18 = vlaneseq  ;;  %s299_s0 = inlined_call_operand.vmem [shape: s32[2,1], index: 0, kind: input, shape index: {}]   ;;  %s300_s1 = inlined_call_operand.vmem [shape: f32[64,32], index: 1, kind: input, shape index: {}]   ;;  %s301_s2 = inlined_call_operand.vmem [shape: f32[32,32], index: 2, kind: input, shape index: {}]   ;;  %s302_s3 = inlined_call_operand.vmem [shape: f32[1,32], index: 3, kind: input, shape index: {}]   ;;  %s303_s4 = inlined_call_operand.vmem [shape: f32[1,32], index: 4, kind: input, shape index: {}]   ;;  %s304_s5 = inlined_call_operand.<no memory space> [shape: f32[1,1], index: 5, kind: input, shape index: {}]   ;;  %s305_s6 = inlined_call_operand.vmem [shape: f32[2,1], index: 6, kind: output, shape index: {}]  }
   0x1   :  { %207 = vset.pattern.permute.xlu0 %v210_v0  ;;  %v25_v1 = vld [vmem:[%s299_s0] sm:$0x3]  ;;  %184 = vmatprep.subr.bf16.mxu0 %v211_v2  ;;  %v36_v4 = vld [vmem:[%s300_s1 + $0x8] sm:$0xff]  ;;  %v37_v6 = vld [vmem:[%s300_s1 + $0x10] sm:$0xff]  ;;  %vm47_vm2 = vcmask 523264   ;;  %vm105_vm3 = vcmask 261120   ;;  %v163_v41 = vstv %s304_s5 }
   0x2   :  { %v35_v3 = vld [vmem:[%s300_s1] sm:$0xff]  ;;  %29 = vperm.xlu0 %207, %v25_v1   ;;  %v38_v7 = vld [vmem:[%s300_s1 + $0x18] sm:$0xff]  ;;  %196 = vmatprep.subr.bf16.mxu1 %v211_v2  ;;  %v40_v10 = vld [vmem:[%s300_s1 + $0x28] sm:$0xff]  ;;  %v27_v19 = vand.u32 127, %v26_v18  ;;  %vm158_vm4 = vcmask 254976   ;;  %vm165_vm5 = vcmask 1024  }
   0x3   :  { %v43_v5 = vpack.c.bf16 %v36_v4, %v35_v3  ;;  %v44_v8 = vpack.c.bf16 %v38_v7, %v37_v6  ;;  %v39_v9 = vld [vmem:[%s300_s1 + $0x20] sm:$0xff]  ;;  %192 = vmatprep.mubr.msk.bf16.mxu0 %vm212_vm0, %v211_v2  ;;  %200 = vmatprep.mubr.msk.bf16.mxu1 %vm212_vm0, %v211_v2  ;;  %v93_v12 = vld [vmem:[%s301_s2 + $0x8] sm:$0xff]  ;;  %v41_v15 = vld [vmem:[%s300_s1 + $0x30] sm:$0xff] }
   0x4   :  { %v92_v11 = vld [vmem:[%s301_s2] sm:$0xff]  ;;  %v45_v13 = vpack.c.bf16 %v40_v10, %v39_v9  ;;  %v42_v16 = vld [vmem:[%s300_s1 + $0x38] sm:$0xff]  ;;  %v94_v23 = vld [vmem:[%s301_s2 + $0x10] sm:$0xff] }
   0x5   :  { %185 = vmatpush3.bf16.msra.mxu0 %v43_v5  ;;  %v96_v14 = vpack.c.bf16 %v93_v12, %v92_v11  ;;  %v46_v17 = vpack.c.bf16 %v42_v16, %v41_v15  ;;  %v95_v24 = vld [vmem:[%s301_s2 + $0x18] sm:$0xff]  ;;  %v173_v31 = vld [vmem:[%s302_s3] ss:$0 sm:$0xff] }
   0x6   :  { %186 = vmatprep.subr.bf16.mxu0 %v211_v2  ;;  %v97_v25 = vpack.c.bf16 %v95_v24, %v94_v23  ;;  %v175_v37 = vld [vmem:[%s303_s4] ss:$0 sm:$0xff] }
   0x7   :  { %197 = vmatpush3.bf16.msra.mxu1 %v96_v14 }
   0x8   :  { %198 = vmatprep.subr.bf16.mxu1 %v211_v2 }
   0x9   :  { %187 = vmatpush3.bf16.msra.mxu0 %v44_v8 }
   0xa   :  { %188 = vmatprep.subr.bf16.mxu0 %v211_v2 }
   0xb   :  { %199 = vmatpush3.bf16.msra.mxu1 %v97_v25 }
   0xd   :  { %189 = vmatpush3.bf16.msra.mxu0 %v45_v13 }
   0xe   :  { %190 = vmatprep.subr.bf16.mxu0 %v211_v2 }
  0x11   :  { %191 = vmatpush3.bf16.msra.mxu0 %v46_v17 }
  0x81   :  { %v30_v20 = vpop.permute.xlu0 %29 }
  0x82   :  { %vm31_vm1 = vcmp.eq.s32.totalorder %v27_v19, %v30_v20 }
  0x83   :  { %v171_v21 = vsel %vm31_vm1, 1.0, %v211_v2 }
  0x84   :  { %v34_v22 = vpack.c.bf16 %v171_v21, %v171_v21 }
  0x86   :  { %193 = vmatmul.mubr.msk.bf16.vlgmr.msra.gmra.mrb[0].mxu0 %vm47_vm2, %v34_v22 }
 0x159   :  { %v85_v26 = vpop.f32.mrb[0].mxu0 }
 0x15a   :  { %v91_v27 = vpack.c.bf16 %v85_v26, %v85_v26  ;;  %v194_v28 = vpop.f32.mrb[1].mxu0 }
 0x15b   :  { %v88_v29 = vpop.f32.mrb[2].mxu0 }
 0x15c   :  { %v195_v30 = vpop.f32.mrb[3].mxu0  ;;  %201 = vmatmul.mubr.msk.bf16.vlgmr.msra.gmra.mrb[0].mxu1 %vm105_vm3, %v91_v27 }
 0x22f   :  { %v143_v32 = vpop.f32.mrb[0].mxu1 }
 0x230   :  { %v144_v33 = vadd.f32 %v173_v31, %v143_v32  ;;  %v202_v34 = vpop.f32.mrb[1].mxu1 }
 0x231   :  { %v146_v35 = vpop.f32.mrb[2].mxu1 }
 0x232   :  { %208 = vtanh.f32 %v144_v33  ;;  %v203_v36 = vpop.f32.mrb[3].mxu1 }
 0x23c   :  { %v209_v38 = vpop.eup %208 }
 0x23d   :  { %v157_v39 = vmul.f32 %v209_v38, %v175_v37 }
 0x23f   :  { %v159_v40 = vsel %vm158_vm4, %v157_v39, 0.0 }
 0x240   :  { %160 = vadd.xlane.f32.xlu0 %v159_v40 }
 0x2cd   :  { %v161_v42 = vpop.xlane.xlu0 %160 }
 0x2ce   :  { %v164_v43 = vadd.f32 %v163_v41, %v161_v42 }
 0x2d0   :  { %166 = vst.msk [vmem:[%s305_s6] sm:$0x3] %vm165_vm5, %v164_v43 }

</bundles_post_ra>
